<compile_context>
chip_gen: v7x
topology: tpu7x:2x2x1
jax: 0.10.0
libtpu: 0.0.40
codegen_flags: <defaults>
</compile_context>

<pallas_src>
import jax
import jax.numpy as jnp
from jax.experimental import pallas as pl
from jax.experimental.pallas import tpu as pltpu


def _vmem_budget():
    """Generation-aware (block_bytes_target, vmem_limit_bytes)."""
    try:
        vmem = pltpu.get_tpu_info().vmem_capacity_bytes
    except Exception:
        vmem = None
    if vmem is not None and vmem <= 64 * 1024 * 1024:
        # v7x-class: 64 MiB VMEM / TC, ~3.2 TB/s HBM -> bigger tiles, keep
        # double-buffered in+out (~4 * block) well under half of VMEM.
        return 6 * 1024 * 1024, 40 * 1024 * 1024
    # v5e / v6e (128 MiB VMEM): ~4 MiB blocks sit at the measured roofline
    # knee; raise the scoped-VMEM limit so 4 * block fits even on v5e's
    # 16 MiB default.
    return 4 * 1024 * 1024, 32 * 1024 * 1024


def _choose_tiles(rows, cols, itemsize, sub, target_bytes):
    """Pick (row_tile, col_tile): lane-dense, (sub,128)-granular or full-dim."""
    # Column tile: full width if a `sub`-row slab fits the budget (full array
    # dim is always a legal block dim), otherwise the largest multiple of 128.
    if cols * sub * itemsize <= target_bytes:
        tc = cols
    else:
        tc = max(128, (target_bytes // (sub * itemsize)) // 128 * 128)
    # Row tile: as many rows (multiple of `sub`, or the full row count) as fit.
    tr_budget = max(sub, (target_bytes // (tc * itemsize)) // sub * sub)
    tr = rows if rows <= tr_budget else tr_budget
    return tr, tc


def _normalize_kernel(x_ref, mean_ref, inv_std_ref, o_ref):
    # Compute in f32 (params are f32); pure VPU elementwise, lane-broadcast of
    # the (tr, 1) params over the spatial (lane) axis.  Mem-bound either way.
    x = x_ref[...].astype(jnp.float32)
    o_ref[...] = ((x - mean_ref[...]) * inv_std_ref[...]).astype(o_ref.dtype)


def normalized_model(x, mean, std):
    """(x - mean) / std with per-channel mean/std, x in NCHW."""
    N, C, H, W = x.shape
    rows, cols = N * C, H * W
    orig_dtype = x.dtype
    itemsize = jnp.dtype(orig_dtype).itemsize
    sub = max(8, 32 // itemsize)  # sublane granularity: 8 (f32), 16 (bf16), ...

    block_bytes, vmem_limit = _vmem_budget()
    tr, tc = _choose_tiles(rows, cols, itemsize, sub, block_bytes)
    grid_r = pl.cdiv(rows, tr)
    grid_c = pl.cdiv(cols, tc)

    # Per-(n, c) row parameters, kept in float32 (tiny: (rows, 1)).
    inv_std = 1.0 / std.astype(jnp.float32)
    mean_rows = jnp.tile(mean.astype(jnp.float32).reshape(C, 1), (N, 1))
    inv_std_rows = jnp.tile(inv_std.reshape(C, 1), (N, 1))

    x2 = x.reshape(rows, cols)

    if grid_r == 1 and grid_c > 1:
        # Megacore (v7x): make the axis with real work the leading parallel dim.
        grid = (grid_c, grid_r)
        x_map = lambda j, i: (i, j)
        p_map = lambda j, i: (i, 0)
    else:
        grid = (grid_r, grid_c)
        x_map = lambda i, j: (i, j)
        p_map = lambda i, j: (i, 0)  # params resident across the fast col axis

    cost = pl.CostEstimate(
        flops=2 * rows * cols,
        transcendentals=0,
        bytes_accessed=2 * rows * cols * itemsize + 2 * rows * 4,
    )

    out2 = pl.pallas_call(
        _normalize_kernel,
        out_shape=jax.ShapeDtypeStruct((rows, cols), orig_dtype),
        grid=grid,
        in_specs=[
            pl.BlockSpec((tr, tc), x_map),
            pl.BlockSpec((tr, 1), p_map),
            pl.BlockSpec((tr, 1), p_map),
        ],
        out_specs=pl.BlockSpec((tr, tc), x_map),
        compiler_params=pltpu.CompilerParams(
            dimension_semantics=("parallel", "parallel"),
            vmem_limit_bytes=vmem_limit,
        ),
        cost_estimate=cost,
    )(x2, mean_rows, inv_std_rows)

    return out2.reshape(N, C, H, W)


if __name__ == "__main__":
    key = jax.random.PRNGKey(0)
    kx, km, ks = jax.random.split(key, 3)

    N, C, H, W = 2, 4, 16, 16
    x = jax.random.normal(kx, (N, C, H, W), dtype=jnp.float32)
    # Deterministic "dataset statistics" (per-channel), like torchvision stats.
    mean = jax.random.uniform(km, (C,), dtype=jnp.float32, minval=0.3, maxval=0.7)
    std = jax.random.uniform(ks, (C,), dtype=jnp.float32, minval=0.2, maxval=0.4)

    out = normalized_model(x, mean, std)
    out = jax.block_until_ready(out)

    # Reference check (plain JAX, PyTorch broadcasting semantics of (C,1,1)).
    # Kernel uses (x - mean) * (1/std) in f32 instead of a per-element divide.
    ref = (x - mean.reshape(C, 1, 1)) / std.reshape(C, 1, 1)
    assert out.shape == x.shape and out.dtype == x.dtype
    assert jnp.allclose(out, ref, atol=1e-5, rtol=1e-5)

    print("KERNEL_OK")
</pallas_src>

<mosaic_0001>
module attributes {stable_mosaic.version = 11 : i64} {
  func.func @_normalize_kernel(%arg0: i32, %arg1: i32, %arg2: memref<8x256xf32, #tpu.memory_space<vmem>>, %arg3: memref<8x1xf32, #tpu.memory_space<vmem>>, %arg4: memref<8x1xf32, #tpu.memory_space<vmem>>, %arg5: memref<8x256xf32, #tpu.memory_space<vmem>>) attributes {dimension_semantics = [#tpu.dimension_semantics<parallel>, #tpu.dimension_semantics<parallel>], iteration_bounds = array<i64: 1, 1>, scalar_prefetch = 0 : i64, scratch_operands = 0 : i64, tpu.core_type = #tpu.core_type<tc>, window_params = [{transform_indices = @transform_0, window_bounds = array<i64: 8, 256>}, {transform_indices = @transform_1, window_bounds = array<i64: 8, 1>}, {transform_indices = @transform_2, window_bounds = array<i64: 8, 1>}, {transform_indices = @transform_3, window_bounds = array<i64: 8, 256>}]} {
    %c0 = arith.constant 0 : index
    %c0_0 = arith.constant 0 : index
    %0 = vector.load %arg2[%c0, %c0_0] : memref<8x256xf32, #tpu.memory_space<vmem>>, vector<8x256xf32>
    %c0_1 = arith.constant 0 : index
    %c0_2 = arith.constant 0 : index
    %1 = vector.load %arg3[%c0_1, %c0_2] : memref<8x1xf32, #tpu.memory_space<vmem>>, vector<8x1xf32>
    %2 = vector.broadcast %1 : vector<8x1xf32> to vector<8x256xf32>
    %3 = arith.subf %0, %2 : vector<8x256xf32>
    %c0_3 = arith.constant 0 : index
    %c0_4 = arith.constant 0 : index
    %4 = vector.load %arg4[%c0_3, %c0_4] : memref<8x1xf32, #tpu.memory_space<vmem>>, vector<8x1xf32>
    %5 = vector.broadcast %4 : vector<8x1xf32> to vector<8x256xf32>
    %6 = arith.mulf %3, %5 : vector<8x256xf32>
    %c0_5 = arith.constant 0 : index
    %c0_6 = arith.constant 0 : index
    %7 = vector.load %arg5[%c0_5, %c0_6] : memref<8x256xf32, #tpu.memory_space<vmem>>, vector<8x256xf32>
    tpu.vector_store %arg5[%c0_5, %c0_6], %6 {strides = array<i32>} : memref<8x256xf32, #tpu.memory_space<vmem>>, vector<8x256xf32>,
    return
  }
  func.func @transform_0(%arg0: i32, %arg1: i32) -> (i32, i32) {
    %c0_i32 = arith.constant 0 : i32
    return %arg0, %arg1 : i32, i32
  }
  func.func @transform_1(%arg0: i32, %arg1: i32) -> (i32, i32) {
    %c0_i32 = arith.constant 0 : i32
    %c0_i32_0 = arith.constant 0 : i32
    return %arg0, %c0_i32 : i32, i32
  }
  func.func @transform_2(%arg0: i32, %arg1: i32) -> (i32, i32) {
    %c0_i32 = arith.constant 0 : i32
    %c0_i32_0 = arith.constant 0 : i32
    return %arg0, %c0_i32 : i32, i32
  }
  func.func @transform_3(%arg0: i32, %arg1: i32) -> (i32, i32) {
    %c0_i32 = arith.constant 0 : i32
    return %arg0, %arg1 : i32, i32
  }
}

</mosaic_0001>

<bundles_post_ra>
// kernel: tpu_custom_call.1
= control target key start
LH: loop header
LB: loop body
LE: loop exit
PB: predicated region body
PF: predicated region fallthrough
CT: control target
= control target key end

     0   :  { %s122_s0 = inlined_call_operand.vmem [shape: f32[8,256], index: 0, kind: input, shape index: {}]   ;;  %s123_s1 = inlined_call_operand.vmem [shape: f32[8,1], index: 1, kind: input, shape index: {}]   ;;  %s124_s2 = inlined_call_operand.vmem [shape: f32[8,1], index: 2, kind: input, shape index: {}]   ;;  %s125_s3 = inlined_call_operand.hbm [shape: f32[8,256], index: 3, kind: output, shape index: {}]  }
   0x1   :  { %v17_v0 = vld [vmem:[%s123_s1] sm:$0xff] }
   0x2   :  { %8 = vsyncpa [#allocation3], 0  ;;  %v76_v1 = vmov 0   ;;  %v25_v2 = vld [vmem:[%s124_s2] sm:$0xff]  ;;  %v16_v5 = vld [vmem:[%s122_s0 + $0x8] sm:$0xff]  ;;  %s77_s20 = smov [#allocation2]  }
   0x3   :  { %51 = vset.pattern.permute.xlu0 %v76_v1  ;;  %v15_v4 = vld [vmem:[%s122_s0] sm:$0xff]  ;;  %s41_s1 = sshll.u32 %s77_s20, 4  ;;  %s42_s1 = int_to_ptr.vmem [resolvable:$true] %s41_s1 }
   0x4   :  { %20 = vperm.xlu0 %51, %v17_v0   ;;  %s52_s2 = scalar_lea.vmem %s42_s1, 256  ;;  %p57_p1 = scmp.lt.s32.totalorder %s42_s1, %s42_s1 }
   0x5   :  { %p53_p0 = scmp.ne.s32.totalorder %s42_s1, %s52_s2  ;;  %p58_p2 = scmp.lt.s32.totalorder %s52_s2, %s52_s2 }
   0x7   :  { %p59_p3 = por %p58_p2, %p57_p1 }
   0x8   :  { %28 = vperm.xlu0 %51, %v25_v2  }
   0x9   :  { %p60_p4 = pnand %p59_p3, %p53_p0 }
  0x83   :  { %v21_v3 = vpop.permute.xlu0 %20 }
  0x84   :  { %v23_v6 = vsub.f32 %v15_v4, %v21_v3  ;;  %v24_v7 = vsub.f32 %v16_v5, %v21_v3 }
  0x87   :  { %v29_v8 = vpop.permute.xlu0 %28 }
  0x88   :  { %v31_v9 = vmul.f32 %v29_v8, %v23_v6  ;;  %v32_v10 = vmul.f32 %v29_v8, %v24_v7 }
  0x8a   :  { %33 = vst [vmem:[#allocation2] sm:$0xff] %v31_v9  ;;  %34 = vst [vmem:[#allocation2 + $0x8] sm:$0xff] %v32_v10 }
  0x8b   :  { %63 = shalt.err (!%p60_p4)
}
  0x8c   :  { %s64_s0 = scalar_lea.hbm %s125_s3, 256 }
  0x8d   :  { %p65_p5 = scmp.ne.s32.totalorder %s125_s3, %s64_s0  ;;  %p68_p6 = scmp.lt.u32.totalorder %s64_s0, %s125_s3 }
  0x8f   :  { %p70_p7 = pnand %p68_p6, %p65_p5 }
  0x91   :  { %73 = shalt.err (!%p70_p7)
}
  0x92   :  { %44 = dma.vmem_to_hbm [thread:$0]  %s42_s1, 256, %s125_s3, [#allocation3]  }
  0x93   :  { %74 = dma.done.wait [#allocation3], 256  }
  0x94   :  { %75 = vsyncadd [#allocation3], 4294967040 }
  0x95   :  { %48 = vsyncpa [#allocation3], 1 }

</bundles_post_ra>
